<compile_context>
chip_gen: v5e
topology: v5e:2x2
jax: 0.10.0
libtpu: 0.0.40
codegen_flags: <defaults>
</compile_context>

<pallas_src>
import jax
import jax.numpy as jnp
import numpy as np
from jax.experimental import pallas as pl
from jax.experimental.pallas import tpu as pltpu


def _round_up(x: int, m: int) -> int:
    return ((x + m - 1) // m) * m


def _vmem_limit(need_bytes: int) -> int:
    """Generation-aware VMEM cap: <= 75% of physical VMEM, >= the 32 MiB default."""
    try:
        cap = int(getattr(pltpu.get_tpu_info(), "vmem_capacity_bytes", 0))
    except Exception:
        cap = 0
    if cap <= 0:
        cap = 64 * 1024 * 1024                     # conservative (v7x) fallback
    cap = cap * 3 // 4                             # leave headroom for compiler temporaries
    return int(min(max(need_bytes, 32 * 1024 * 1024), cap))


# --------------------------- stage 1: per-batch prefix ---------------------------

def _make_prefix_kernel(n_blanks: int):
    def kernel(scal_ref, enc_ref, blank_ref, out_ref):
        # scal_ref:  SMEM f32[2] = [preblank_weight, blank_weight]
        # enc_ref:   VMEM bf16[1, S_p, E_p]   encoder output (padded rows/cols are zero)
        # blank_ref: VMEM f32[1, S_p, 1]      is_blank in {0,1}; padded rows are zero
        # out_ref:   VMEM bf16[1, S_p, E_p]   reweighted encoder
        pre_w = jnp.abs(scal_ref[0])
        blank_w = jnp.abs(scal_ref[1])

        enc = enc_ref[0].astype(jnp.float32)           # [S, E] — prefix math stays f32
        is_blank = blank_ref[0]                        # [S, 1]
        s = enc.shape[0]

        row = jax.lax.broadcasted_iota(jnp.int32, (s, 1), 0)
        keep_first = (row > 0).astype(jnp.float32)     # zero-fill row 0 after shift_right
        keep_last = (row < s - 1).astype(jnp.float32)  # zero-fill last row after shift_left

        # get_first_blanks_in_series + shift_left on the [S,1] column (cheap sublane rolls).
        prev = keep_first * pltpu.roll(is_blank, shift=1, axis=0)        # shift_right
        is_first = is_blank * (1.0 - prev)
        acc_pos = keep_last * pltpu.roll(is_first, shift=s - 1, axis=0)  # shift_left

        # accumulator seeded from the ORIGINAL encoder output (matches torch ordering).
        acc = enc * acc_pos
        # blank re-weighting (straight-through has an identical forward value).
        enc = enc * (1.0 - is_blank) + enc * is_blank * blank_w

        for _ in range(n_blanks):                      # small & static -> unrolled
            acc_pos = keep_first * pltpu.roll(acc_pos, shift=1, axis=0)
            acc = keep_first * pltpu.roll(acc, shift=1, axis=0)
            enc = enc + acc * pre_w
            acc = enc * acc_pos

        # NOTE: rolls across the padded tail rows are safe only because those rows are zero.
        out_ref[0] = enc.astype(out_ref.dtype)

    return kernel


# --------------------------- stage 2: tiled projection ---------------------------

def _proj_kernel(x_ref, w_ref, out_ref):
    # x_ref: bf16[tM, E_p], w_ref: bf16[E_p, tV], out_ref: [tM, tV]
    out_ref[...] = jnp.dot(x_ref[...], w_ref[...],
                           preferred_element_type=jnp.float32).astype(out_ref.dtype)


def prepare_weight(weight, tile_v: int = 512):
    """One-time prep of the torch-layout [V, E] head weight: transpose -> bf16 -> pad to
    [E_p, V_p]. Call once at parameter-load time, NOT inside the per-forward path."""
    V, E = weight.shape
    E_p = _round_up(E, 128)
    tV = min(_round_up(max(tile_v, 256), 256), _round_up(V, 256))   # 256-aligned V tiles
    V_p = _round_up(V, tV)
    w = weight.T.astype(jnp.bfloat16)
    if (E_p, V_p) != (E, V):
        w = jnp.pad(w, ((0, E_p - E), (0, V_p - V)))
    return w, V, E, tV


def blank_diff_prediction_head(encoder_output, model_input, prepared_weight,
                               blank_tokens_ids, n_blanks,
                               preblank_weight, blank_weight,
                               learnable_weights=True, tile_m=512,
                               out_dtype=jnp.float32):
    """prepared_weight is the tuple returned by prepare_weight()."""
    w_pad, V, E, tV = prepared_weight
    E_p, V_p = w_pad.shape
    n_v = V_p // tV
    B, S, E_in = encoder_output.shape
    assert E_in == E, "encoder embedding dim must match the projection weight"

    # ---- cheap [B, S] glue: token-id membership (no clean in-kernel isin) ----
    ib = jnp.isin(model_input, blank_tokens_ids).astype(jnp.float32)

    if learnable_weights:
        scalars = jnp.stack([jnp.asarray(preblank_weight, jnp.float32),
                             jnp.asarray(blank_weight, jnp.float32)])
    else:
        scalars = jnp.array([1.0, 1.0], dtype=jnp.float32)  # non-learnable == unit weights

    # ---- pad to TPU-friendly shapes (bf16 sublane packing, lane-dense stores) ----
    S_p = _round_up(S, 16)
    enc_bf = encoder_output.astype(jnp.bfloat16)             # stream encoder at half bandwidth
    if (S_p, E_p) != (S, E):
        enc_bf = jnp.pad(enc_bf, ((0, 0), (0, S_p - S), (0, E_p - E)))
    blank_col = ib[..., None]                                # [B, S, 1]
    if S_p != S:
        blank_col = jnp.pad(blank_col, ((0, 0), (0, S_p - S), (0, 0)))

    # ---------------- stage 1: per-batch prefix -> bf16 [B, S_p, E_p] ----------------
    prefix_vmem = (2 * S_p * E_p * 2 + 2 * S_p * E_p * 2     # in/out bf16, double-buffered
                   + 2 * S_p * 128 * 4                       # lane-padded mask column
                   + 6 * S_p * E_p * 4 + (2 << 20))          # f32 temporaries + headroom
    prefix = pl.pallas_call(
        _make_prefix_kernel(n_blanks),
        out_shape=jax.ShapeDtypeStruct((B, S_p, E_p), jnp.bfloat16),
        grid=(B,),
        in_specs=[
            pl.BlockSpec(memory_space=pltpu.MemorySpace.SMEM),   # [pre_w, blank_w]
            pl.BlockSpec((1, S_p, E_p), lambda b: (b, 0, 0)),    # encoder (bf16)
            pl.BlockSpec((1, S_p, 1), lambda b: (b, 0, 0)),      # is_blank column
        ],
        out_specs=pl.BlockSpec((1, S_p, E_p), lambda b: (b, 0, 0)),
        compiler_params=pltpu.CompilerParams(
            dimension_semantics=("parallel",),
            vmem_limit_bytes=_vmem_limit(prefix_vmem),
        ),
    )(scalars, enc_bf, blank_col)
    # TODO(synk): for very long sequences also tile S here with an n_blanks-row halo.

    # -------------- stage 2: (B*S_p, E_p) x (E_p, V_p) tiled matmul on the MXU --------------
    M = B * S_p
    x = prefix.reshape(M, E_p)                       # leading-dim collapse, no data movement
    tM = min(_round_up(max(tile_m, 16), 16), M)
    M_p = _round_up(M, tM)
    if M_p != M:
        x = jnp.pad(x, ((0, M_p - M), (0, 0)))
    n_m = M_p // tM

    out_itemsize = jnp.dtype(out_dtype).itemsize
    proj_vmem = (2 * tM * E_p * 2 + 2 * E_p * tV * 2
                 + 2 * tM * tV * out_itemsize + (4 << 20))
    cost = pl.CostEstimate(
        flops=2 * M_p * E_p * V_p,
        transcendentals=0,
        # x read once (constant across inner V steps), weight streamed n_m times, out written once
        bytes_accessed=M_p * E_p * 2 + n_m * E_p * V_p * 2 + M_p * V_p * out_itemsize,
    )
    out_pad = pl.pallas_call(
        _proj_kernel,
        out_shape=jax.ShapeDtypeStruct((M_p, V_p), out_dtype),
        grid=(n_m, n_v),                               # M outer -> weight tiles stream inner
        in_specs=[
            pl.BlockSpec((tM, E_p), lambda m, v: (m, 0)),   # reweighted encoder rows (bf16)
            pl.BlockSpec((E_p, tV), lambda m, v: (0, v)),   # weight tile (bf16)
        ],
        out_specs=pl.BlockSpec((tM, tV), lambda m, v: (m, v)),
        compiler_params=pltpu.CompilerParams(
            dimension_semantics=("parallel", "parallel"),   # both v7x TCs busy even at B == 1
            vmem_limit_bytes=_vmem_limit(proj_vmem),
        ),
        cost_estimate=cost,
    )(x, w_pad)

    return out_pad[:M].reshape(B, S_p, V_p)[:, :S, :V]


# --------------------------------- reference ---------------------------------

def reference(encoder_output, model_input, weight, blank_ids, n_blanks,
              preblank_weight, blank_weight):
    """Pure-JAX mirror of the PyTorch forward with the kernel's numerics
    (bf16 encoder stream, f32 prefix math, bf16 MXU matmul with f32 accumulation)."""
    enc = encoder_output.astype(jnp.bfloat16).astype(jnp.float32)
    ib = jnp.isin(model_input, blank_ids).astype(jnp.float32)
    prev = jnp.concatenate([jnp.zeros_like(ib[:, :1]), ib[:, :-1]], axis=1)
    is_first = ib * (1.0 - prev)
    is_pre = jnp.concatenate([is_first[:, 1:], jnp.zeros_like(is_first[:, :1])], axis=1)

    acc_pos = is_pre[..., None]
    acc = enc * acc_pos
    enc = enc * (1.0 - ib[..., None]) + enc * ib[..., None] * abs(blank_weight)

    def shift_right(x):
        return jnp.concatenate([jnp.zeros_like(x[:, :1]), x[:, :-1]], axis=1)

    for _ in range(n_blanks):
        acc_pos = shift_right(acc_pos)
        acc = shift_right(acc)
        enc = enc + acc * abs(preblank_weight)
        acc = enc * acc_pos

    return jnp.einsum("bse,ev->bsv", enc.astype(jnp.bfloat16),
                      weight.T.astype(jnp.bfloat16),
                      preferred_element_type=jnp.float32)


if __name__ == "__main__":
    # deliberately non-aligned sizes to exercise padding + M and V tiling
    B, S, E, V = 2, 20, 96, 320       # batch, seq, embedding_dim, output_size
    n_blanks = 2
    blank_tokens_ids = jnp.array([1, 2], dtype=jnp.int32)
    preblank_weight = 1.0             # torch init: Parameter(1.0)
    blank_weight = 0.5                # initial_blank_weight
    init_scale = 1.0

    key = jax.random.PRNGKey(0)
    k_enc, k_tok, k_w = jax.random.split(key, 3)
    encoder_output = jax.random.normal(k_enc, (B, S, E), dtype=jnp.float32)
    model_input = jax.random.randint(k_tok, (B, S), 0, 8, dtype=jnp.int32)  # ids 1,2 are blanks

    # misc.Linear(embedding_dim, output_size, bias=False): weight [V, E]; deterministic init.
    weight = jax.random.normal(k_w, (V, E), dtype=jnp.float32) * (init_scale / np.sqrt(E))

    prepared = prepare_weight(weight, tile_v=256)   # one-time prep, outside the hot path
    out = blank_diff_prediction_head(
        encoder_output, model_input, prepared, blank_tokens_ids, n_blanks,
        preblank_weight, blank_weight, learnable_weights=True, tile_m=32)
    out = jax.block_until_ready(out)

    ref = reference(encoder_output, model_input, weight, blank_tokens_ids,
                    n_blanks, preblank_weight, blank_weight)
    np.testing.assert_allclose(np.asarray(out), np.asarray(ref), rtol=1e-2, atol=1e-2)
    print("KERNEL_OK")
</pallas_src>

<mosaic_0001>
module attributes {stable_mosaic.version = 11 : i64} {
  func.func @kernel(%arg0: i32, %arg1: memref<2xf32, #tpu.memory_space<smem>>, %arg2: memref<1x32x128xbf16, #tpu.memory_space<vmem>>, %arg3: memref<1x32x1xf32, #tpu.memory_space<vmem>>, %arg4: memref<1x32x128xbf16, #tpu.memory_space<vmem>>) attributes {dimension_semantics = [#tpu.dimension_semantics<parallel>], iteration_bounds = array<i64: 2>, scalar_prefetch = 0 : i64, scratch_operands = 0 : i64, tpu.core_type = #tpu.core_type<tc>, window_params = [{transform_indices = @transform_0, window_bounds = array<i64: 2>}, {transform_indices = @transform_1, window_bounds = array<i64: 1, 32, 128>}, {transform_indices = @transform_2, window_bounds = array<i64: 1, 32, 1>}, {transform_indices = @transform_3, window_bounds = array<i64: 1, 32, 128>}]} {
    %c0 = arith.constant 0 : index
    %0 = memref.load %arg1[%c0] : memref<2xf32, #tpu.memory_space<smem>>
    %1 = math.absf %0 : f32
    %c1 = arith.constant 1 : index
    %2 = memref.load %arg1[%c1] : memref<2xf32, #tpu.memory_space<smem>>
    %3 = math.absf %2 : f32
    %c0_0 = arith.constant 0 : index
    %c0_1 = arith.constant 0 : index
    %c0_2 = arith.constant 0 : index
    %4 = vector.load %arg2[%c0_0, %c0_1, %c0_2] : memref<1x32x128xbf16, #tpu.memory_space<vmem>>, vector<1x32x128xbf16>
    %5 = vector.shape_cast %4 : vector<1x32x128xbf16> to vector<32x128xbf16>
    %6 = arith.extf %5 : vector<32x128xbf16> to vector<32x128xf32>
    %c0_3 = arith.constant 0 : index
    %c0_4 = arith.constant 0 : index
    %c0_5 = arith.constant 0 : index
    %7 = vector.load %arg3[%c0_3, %c0_4, %c0_5] : memref<1x32x1xf32, #tpu.memory_space<vmem>>, vector<1x32x1xf32>
    %8 = vector.shape_cast %7 : vector<1x32x1xf32> to vector<32x1xf32>
    %9 = tpu.iota {dimensions = array<i32: 0>} : vector<32x1xi32>
    %c0_i32 = arith.constant 0 : i32
    %10 = vector.broadcast %c0_i32 : i32 to vector<32x1xi32>
    %11 = arith.cmpi sgt, %9, %10 : vector<32x1xi32>
    %12 = arith.extui %11 : vector<32x1xi1> to vector<32x1xi32>
    %13 = arith.sitofp %12 : vector<32x1xi32> to vector<32x1xf32>
    %c31_i32 = arith.constant 31 : i32
    %14 = vector.broadcast %c31_i32 : i32 to vector<32x1xi32>
    %15 = arith.cmpi slt, %9, %14 : vector<32x1xi32>
    %16 = arith.extui %15 : vector<32x1xi1> to vector<32x1xi32>
    %17 = arith.sitofp %16 : vector<32x1xi32> to vector<32x1xf32>
    %c1_i32 = arith.constant 1 : i32
    %18 = tpu.dynamic_rotate %8 by %c1_i32 dim 0 : vector<32x1xf32>, i32 -> vector<32x1xf32>
    %19 = arith.mulf %13, %18 : vector<32x1xf32>
    %cst = arith.constant 1.000000e+00 : f32
    %20 = vector.broadcast %cst : f32 to vector<32x1xf32>
    %21 = arith.subf %20, %19 : vector<32x1xf32>
    %22 = arith.mulf %8, %21 : vector<32x1xf32>
    %c31_i32_6 = arith.constant 31 : i32
    %23 = tpu.dynamic_rotate %22 by %c31_i32_6 dim 0 : vector<32x1xf32>, i32 -> vector<32x1xf32>
    %24 = arith.mulf %17, %23 : vector<32x1xf32>
    %25 = vector.broadcast %24 : vector<32x1xf32> to vector<32x128xf32>
    %26 = arith.mulf %6, %25 : vector<32x128xf32>
    %cst_7 = arith.constant 1.000000e+00 : f32
    %27 = vector.broadcast %cst_7 : f32 to vector<32x1xf32>
    %28 = arith.subf %27, %8 : vector<32x1xf32>
    %29 = vector.broadcast %28 : vector<32x1xf32> to vector<32x128xf32>
    %30 = arith.mulf %6, %29 : vector<32x128xf32>
    %31 = vector.broadcast %8 : vector<32x1xf32> to vector<32x128xf32>
    %32 = arith.mulf %6, %31 : vector<32x128xf32>
    %33 = vector.broadcast %3 : f32 to vector<32x128xf32>
    %34 = arith.mulf %32, %33 : vector<32x128xf32>
    %35 = arith.addf %30, %34 : vector<32x128xf32>
    %c1_i32_8 = arith.constant 1 : i32
    %36 = tpu.dynamic_rotate %24 by %c1_i32_8 dim 0 : vector<32x1xf32>, i32 -> vector<32x1xf32>
    %37 = arith.mulf %13, %36 : vector<32x1xf32>
    %c1_i32_9 = arith.constant 1 : i32
    %38 = tpu.dynamic_rotate %26 by %c1_i32_9 dim 0 : vector<32x128xf32>, i32 -> vector<32x128xf32>
    %39 = vector.broadcast %13 : vector<32x1xf32> to vector<32x128xf32>
    %40 = arith.mulf %39, %38 : vector<32x128xf32>
    %41 = vector.broadcast %1 : f32 to vector<32x128xf32>
    %42 = arith.mulf %40, %41 : vector<32x128xf32>
    %43 = arith.addf %35, %42 : vector<32x128xf32>
    %44 = vector.broadcast %37 : vector<32x1xf32> to vector<32x128xf32>
    %45 = arith.mulf %43, %44 : vector<32x128xf32>
    %c1_i32_10 = arith.constant 1 : i32
    %46 = tpu.dynamic_rotate %45 by %c1_i32_10 dim 0 : vector<32x128xf32>, i32 -> vector<32x128xf32>
    %47 = vector.broadcast %13 : vector<32x1xf32> to vector<32x128xf32>
    %48 = arith.mulf %47, %46 : vector<32x128xf32>
    %49 = vector.broadcast %1 : f32 to vector<32x128xf32>
    %50 = arith.mulf %48, %49 : vector<32x128xf32>
    %51 = arith.addf %43, %50 : vector<32x128xf32>
    %52 = arith.truncf %51 : vector<32x128xf32> to vector<32x128xbf16>
    %c0_11 = arith.constant 0 : index
    %c0_12 = arith.constant 0 : index
    %c0_13 = arith.constant 0 : index
    %53 = vector.load %arg4[%c0_11, %c0_12, %c0_13] : memref<1x32x128xbf16, #tpu.memory_space<vmem>>, vector<1x32x128xbf16>
    %54 = vector.shape_cast %53 : vector<1x32x128xbf16> to vector<32x128xbf16>
    %55 = vector.shape_cast %52 : vector<32x128xbf16> to vector<1x32x128xbf16>
    tpu.vector_store %arg4[%c0_11, %c0_12, %c0_13], %55 {strides = array<i32>} : memref<1x32x128xbf16, #tpu.memory_space<vmem>>, vector<1x32x128xbf16>,
    return
  }
  func.func @transform_0(%arg0: i32) -> i32 {
    %c0_i32 = arith.constant 0 : i32
    %c0_i32_0 = arith.constant 0 : i32
    return %c0_i32 : i32
  }
  func.func @transform_1(%arg0: i32) -> (i32, i32, i32) {
    %c0_i32 = arith.constant 0 : i32
    %c0_i32_0 = arith.constant 0 : i32
    %c0_i32_1 = arith.constant 0 : i32
    return %arg0, %c0_i32, %c0_i32_0 : i32, i32, i32
  }
  func.func @transform_2(%arg0: i32) -> (i32, i32, i32) {
    %c0_i32 = arith.constant 0 : i32
    %c0_i32_0 = arith.constant 0 : i32
    %c0_i32_1 = arith.constant 0 : i32
    return %arg0, %c0_i32, %c0_i32_0 : i32, i32, i32
  }
  func.func @transform_3(%arg0: i32) -> (i32, i32, i32) {
    %c0_i32 = arith.constant 0 : i32
    %c0_i32_0 = arith.constant 0 : i32
    %c0_i32_1 = arith.constant 0 : i32
    return %arg0, %c0_i32, %c0_i32_0 : i32, i32, i32
  }
}

</mosaic_0001>

<bundles_post_ra>
// kernel: tpu_custom_call.1
= control target key start
LH: loop header
LB: loop body
LE: loop exit
PB: predicated region body
PF: predicated region fallthrough
CT: control target
= control target key end

     0   :  { %8 = vsyncpa [#allocation4], 0  ;;  %s916_s0 = inlined_call_operand.vmem [shape: f32[2], index: 0, kind: input, shape index: {}]   ;;  %s917_s1 = inlined_call_operand.vmem [shape: bf16[2,32,128], index: 1, kind: input, shape index: {}]   ;;  %s918_s2 = inlined_call_operand.vmem [shape: f32[2,32,1], index: 2, kind: input, shape index: {}]   ;;  %s919_s3 = inlined_call_operand.hbm [shape: bf16[2,32,128], index: 3, kind: output, shape index: {}]  }
   0x1   :  { %9 = vsyncpa [#allocation3], 0 }
   0x2   :  { %11 = vsyncpa [#allocation3 + $0x1], 0  ;;  %s761_s12 = smov 0   ;;  %s763_s13 = smov 0  }
   0x3   :  { %s765_s14 = smov 0   ;;  %s767_s15 = smov 0  }
   0x4 LB: > { %s782_s16 = sadd.s32 4294967295, %s734_s15   ;;  %s554_s17 = sadd.s32 4294967294, %s734_s15   ;;  %s734_s15 = sphi %s767_s15, %s925_s15   ;;  %s730_s14 = sphi %s765_s14, %s924_s14   ;;  %s726_s13 = sphi %s763_s13, %s923_s13   ;;  %s722_s12 = sphi %s761_s12, %s922_s12  }
   0x5   : > { %s786_s18 = sadd.s32 1, %s734_s15   ;;  %s97_s19 = sadd.s32 1, %s730_s14 }
   0x6   : > { %s94_s20 = ssub.s32 %s734_s15, %s786_s18  ;;  %p107_p0 = scmp.ne.s32.totalorder %s730_s14, %s726_s13 }
   0x7   : > { %p95_p1 = scmp.eq.s32.totalorder %s94_s20, 0  ;;  %p108_p2 = scmp.eq.s32.totalorder %s782_s16, 1 }
   0x8   : > { %p113_p3 = scmp.ne.s32.totalorder %s726_s13, %s722_s12  ;;  %p114_p4 = scmp.eq.s32.totalorder %s554_s17, 1 }
   0x9   : > { %s797_s21 = scalar_select %p95_p1, %s730_s14, %s97_s19  }
   0xa   : > { %p799_p5 = por %p108_p2, %p107_p0  ;;  %p803_p6 = por %p114_p4, %p113_p3 }
   0xb   : > { %p555_p7 = scmp.ge.s32.totalorder %s734_s15, 1  ;;  %p121_p8 = scmp.lt.s32.totalorder %s734_s15, 3 }
   0xc   : > { %p610_p9 = scmp.eq.s32.totalorder %s782_s16, 0  ;;  %s133_s26 = sshll.u32 %s916_s0, 4  ;;  %s134_s26 = int_to_ptr.vmem [resolvable:$true] %s133_s26 }
   0xd   : > { %p122_p10 = pnand %p555_p7, %p121_p8  ;;  %s736_s27 = smov [#allocation2]  }
   0xf   : > { %p602_p11 = pneg %p122_p10  ;;  %162 = sbr.rel (%p122_p10) target bundleno = 203 (0xcb), region = 32 }
  0x11   : > { %p603_p12 = pnand %p610_p9, %p602_p11 }
  0x13   : > { %605 = dma.vmem_to_smem (!%p603_p12), %s134_s26, 16, %s736_s27, [#allocation4]  }
  0x14   : > { %713 = dma.done.wait (%p610_p9), [#allocation4], 16  }
  0x15   : > { %715 = vsyncadd (%p610_p9), [#allocation4], 4294967280 }
  0x16   : > { %169 = sfence }
  0x17   : > { %p193_p13 = scmp.lt.s32.totalorder %s782_s16, 1  ;;  %v219_v0 = vlaneseq  ;;  %v737_v1 = vmov 0   ;;  %v738_v6 = vmov 0.0   ;;  %s565_s10 = sld [smem:[#allocation2 + $0x1]] }
  0x18   : > { %652 = vset.pattern.permute.xlu2 %v737_v1  ;;  %651 = vset.pattern.permute.xlu1 %v737_v1  ;;  %s859_s11 = sld [smem:[#allocation2]]  ;;  %s190_s20 = sand.u32 1, %s726_s13  }
  0x19   : > { %650 = vset.pattern.permute.xlu0 %v737_v1  ;;  %s815_s28 = scalar_select %p193_p13, %s782_s16, 1  ;;  %v817_v2 = vshrl.u32 %v219_v0, 7 }
  0x1a   : > { %s560_s24 = sshll.u32 %s190_s20, 4  ;;  %s575_s25 = sshll.u32 %s782_s16, 4 }
  0x1b   : > { %s574_s29 = sshll.u32 %s815_s28, 5  ;;  %vm224_vm0 = vcmp.gt.s32.totalorder %v817_v2, 0  ;;  %vm252_vm1 = vcmp.lt.s32.totalorder %v817_v2, 1  ;;  %v223_v23 = vadd.s32 24, %v817_v2  ;;  %vm273_vm2 = vcmp.lt.s32.totalorder %v817_v2, 7  ;;  %s573_s6 = sshll.u32 %s815_s28, 4 }
  0x1c   : > { %s202_s5 = scalar_lea.vmem %s918_s2, %s574_s29  ;;  %v825_v7 = vsel %vm224_vm0, 1.0, %v738_v6  ;;  %s197_s9 = scalar_lea.vmem %s917_s1, %s573_s6 }
  0x1d   : > { %v218_v3 = vld [vmem:[%s202_s5 + $0x18] sm:$0xff]  ;;  %v216_v4 = vld [vmem:[%s202_s5 + $0x8] sm:$0xff]  ;;  %v215_v5 = vld [vmem:[%s202_s5] sm:$0xff]  ;;  %vm239_vm3 = vcmp.lt.s32.totalorder %v223_v23, 31  ;;  %s206_s17 = sand.u32 2147483647, %s565_s10  ;;  %s464_s28 = scalar_lea.hbm %s919_s3, %s575_s25 }
  0x1e   : > { %351 = vperm.xlu1 %651, %v218_v3   ;;  %v251_v8 = vrot.slane %v218_v3, 7  ;;  %336 = vperm.xlu0 %650, %v215_v5   ;;  %v248_v9 = vrot.slane %v215_v5, 7  ;;  %v306_v10 = vsub.f32 1.0, %v215_v5  ;;  %v217_v11 = vld [vmem:[%s202_s5 + $0x10] sm:$0xff]  ;;  %v249_v12 = vrot.slane %v216_v4, 7  ;;  %v577_v57 = vld [vmem:[%s197_s9] sm:$0xff]  }
  0x1f   : > { %v250_v13 = vrot.slane %v217_v11, 7  ;;  %v307_v27 = vsub.f32 1.0, %v216_v4  ;;  %v567_v35 = vsel %vm239_vm3, 1.0, %v738_v6  ;;  %v309_v37 = vsub.f32 1.0, %v218_v3  ;;  %v594_v58 = vld [vmem:[%s197_s9 + $0x8] sm:$0xff]   ;;  %s192_s29 = scalar_lea.vmem [#allocation5], %s560_s24 }
  0x20   : > { %312 = vperm.xlu2 %652, %v306_v10   ;;  %v255_v14 = vsel %vm252_vm1, %v248_v9, %v249_v12  ;;  %v256_v15 = vsel %vm252_vm1, %v251_v8, %v248_v9  ;;  %v308_v40 = vsub.f32 1.0, %v217_v11  ;;  %v582_v59 = vunpack.c.l.bf16 %v594_v58  ;;  %s204_s19 = sand.u32 2147483647, %s859_s11  ;;  %s465_s16 = sshll.u32 %s192_s29, 4  ;;  %s466_s16 = int_to_ptr.vmem [resolvable:$true] %s465_s16 }
  0x21   : > { %v253_v16 = vsel %vm252_vm1, %v250_v13, %v251_v8  ;;  %v254_v17 = vsel %vm252_vm1, %v249_v12, %v250_v13  ;;  %v262_v18 = vsub.f32 1.0, %v255_v14  ;;  %v257_v19 = vmul.f32 %v825_v7, %v256_v15  ;;  %s467_s30 = sshll.u32 %s464_s28, 4  ;;  %s453_s4 = scalar_lea.sflag [#allocation3], %s190_s20  ;;  %s468_s30 = int_to_ptr.hbm [resolvable:$true] %s467_s30 }
  0x22   : > { %v263_v20 = vsub.f32 1.0, %v254_v17  ;;  %v264_v21 = vsub.f32 1.0, %v253_v16  ;;  %v578_v60 = vunpack.c.l.bf16 %v577_v57  ;;  %v583_v61 = vunpack.c.h.bf16 %v594_v58  ;;  %s682_s5 = sshra.s32 %s468_s30, 4  ;;  %s688_s9 = scalar_lea.hbm %s919_s3, 32  ;;  %s683_s5 = int_to_ptr.hbm [resolvable:$true] %s682_s5 }
  0x23   : > { %v266_v22 = vmul.f32 %v262_v18, %v216_v4  ;;  %v261_v24 = vsub.f32 1.0, %v257_v19  ;;  %v579_v62 = vunpack.c.h.bf16 %v577_v57  ;;  %v358_v13 = vstv %s206_s17  ;;  %s684_s6 = scalar_lea.hbm %s683_s5, 16  ;;  %p689_p3 = scmp.lt.s32.totalorder %s683_s5, %s919_s3 }
  0x24   : > { %v267_v25 = vmul.f32 %v263_v20, %v217_v11  ;;  %v268_v26 = vmul.f32 %v264_v21, %v218_v3  ;;  %p685_p0 = scmp.ne.s32.totalorder %s683_s5, %s684_s6  ;;  %p690_p4 = scmp.lt.s32.totalorder %s688_s9, %s684_s6 }
  0x25   : > { %v270_v28 = vrot.slane %v266_v22, 1  ;;  %v265_v29 = vmul.f32 %v261_v24, %v215_v5 }
  0x26   : > { %v271_v30 = vrot.slane %v267_v25, 1  ;;  %v272_v31 = vrot.slane %v268_v26, 1  ;;  %v391_v26 = vstv %s204_s19  ;;  %p686_p1 = pnand %p685_p0, %p799_p5  ;;  %p691_p7 = por %p690_p4, %p689_p3 }
  0x27   : > { %v269_v32 = vrot.slane %v265_v29, 1 }
  0x28   : > { %v274_v33 = vsel %vm273_vm2, %v271_v30, %v272_v31  ;;  %317 = vperm.xlu2 %652, %v307_v27   ;;  %v275_v34 = vsel %vm273_vm2, %v270_v28, %v271_v30  ;;  %p687_p2 = pneg %p686_p1 }
  0x29   : > { %294 = vperm.xlu1 %651, %v274_v33   ;;  %289 = vperm.xlu0 %650, %v275_v34   ;;  %v277_v36 = vsel %vm273_vm2, %v272_v31, %v269_v32  ;;  %v276_v39 = vsel %vm273_vm2, %v269_v32, %v270_v28  ;;  %v368_v43 = vrot.slane %v275_v34, 7  ;;  %v369_v44 = vrot.slane %v274_v33, 7 }
  0x2a   : > { %v281_v38 = vmul.f32 %v567_v35, %v277_v36  ;;  %v367_v42 = vrot.slane %v276_v39, 7  ;;  %p692_p8 = pnand %p691_p7, %p687_p2 }
  0x2b   : > { %v372_v49 = vsel %vm252_vm1, %v368_v43, %v369_v44 }
  0x2c   : > { %v370_v41 = vrot.slane %v281_v38, 7  ;;  %v373_v47 = vsel %vm252_vm1, %v367_v42, %v368_v43 }
  0x2e   : > { %v374_v45 = vsel %vm252_vm1, %v370_v41, %v367_v42  ;;  %v371_v48 = vsel %vm252_vm1, %v369_v44, %v370_v41 }
  0x2f   : > { %v375_v46 = vmul.f32 %v825_v7, %v374_v45 }
  0x30   : > { %327 = vperm.xlu2 %652, %v309_v37  }
  0x31   : > { %299 = vperm.xlu1 %651, %v281_v38   ;;  %284 = vperm.xlu0 %650, %v276_v39  }
  0x38   : > { %322 = vperm.xlu2 %652, %v308_v40  }
  0x39   : > { %346 = vperm.xlu1 %651, %v217_v11   ;;  %341 = vperm.xlu0 %650, %v216_v4  }
  0x40   : > { %407 = vperm.xlu2 %652, %v373_v47  }
  0x41   : > { %417 = vperm.xlu1 %651, %v371_v48   ;;  %402 = vperm.xlu0 %650, %v375_v46  }
  0x49   : > { %412 = vperm.xlu0 %650, %v372_v49  }
  0x7a   : > { %v313_v50 = vpop.permute.xlu2 %312 }
  0x7b   : > { %v330_v16 = vmul.f32 %v578_v60, %v313_v50 }
  0x82   : > { %v318_v53 = vpop.permute.xlu2 %317 }
  0x83   : > { %v331_v25 = vmul.f32 %v579_v62, %v318_v53 }
  0x8a   : > { %v328_v56 = vpop.permute.xlu2 %327 }
  0x8b   : > { %v333_v21 = vmul.f32 %v583_v61, %v328_v56 }
  0x90   : > { %v352_v51 = vpop.permute.xlu1 %351  ;;  %v337_v52 = vpop.permute.xlu0 %336 }
  0x91   : > { %v357_v9 = vmul.f32 %v583_v61, %v352_v51  ;;  %v354_v10 = vmul.f32 %v578_v60, %v337_v52 }
  0x92   : > { %v323_v11 = vpop.permute.xlu2 %322 }
  0x93   : > { %v362_v22 = vmul.f32 %v358_v13, %v357_v9  ;;  %v359_v23 = vmul.f32 %v358_v13, %v354_v10  ;;  %v332_v43 = vmul.f32 %v582_v59, %v323_v11 }
  0x95   : > { %v366_v34 = vadd.f32 %v362_v22, %v333_v21  ;;  %v363_v35 = vadd.f32 %v359_v23, %v330_v16 }
  0x9a   : > { %v408_v36 = vpop.permute.xlu2 %407 }
  0x9b   : > { %v295_v54 = vpop.permute.xlu1 %294  ;;  %v290_v55 = vpop.permute.xlu0 %289 }
  0x9c   : > { %v304_v4 = vmul.f32 %v582_v59, %v295_v54  ;;  %v303_v8 = vmul.f32 %v579_v62, %v290_v55 }
  0x9e   : > { %v381_v14 = vrot.slane %v304_v4, 7  ;;  %v380_v17 = vrot.slane %v303_v8, 7 }
  0xa0   : > { %v384_v47 = vsel %vm252_vm1, %v380_v17, %v381_v14 }
  0xa1   : > { %v394_v54 = vmul.f32 %v391_v26, %v384_v47 }
  0xa3   : > { %v300_v63 = vpop.permute.xlu1 %299  ;;  %v285_v0 = vpop.permute.xlu0 %284 }
  0xa4   : > { %v305_v1 = vmul.f32 %v583_v61, %v300_v63  ;;  %v302_v3 = vmul.f32 %v578_v60, %v285_v0 }
  0xa6   : > { %v382_v5 = vrot.slane %v305_v1, 7  ;;  %v379_v6 = vrot.slane %v302_v3, 7 }
  0xa8   : > { %v386_v12 = vsel %vm252_vm1, %v382_v5, %v379_v6  ;;  %v383_v20 = vsel %vm252_vm1, %v381_v14, %v382_v5  ;;  %v385_v27 = vsel %vm252_vm1, %v379_v6, %v380_v17 }
  0xa9   : > { %v387_v15 = vmul.f32 %v825_v7, %v386_v12  ;;  %v395_v30 = vmul.f32 %v391_v26, %v383_v20  ;;  %v393_v32 = vmul.f32 %v391_v26, %v385_v27 }
  0xab   : > { %v347_v18 = vpop.permute.xlu1 %346  ;;  %v342_v19 = vpop.permute.xlu0 %341  ;;  %v392_v31 = vmul.f32 %v391_v26, %v387_v15  ;;  %v399_v39 = vadd.f32 %v395_v30, %v366_v34 }
  0xac   : > { %v355_v24 = vmul.f32 %v579_v62, %v342_v19  ;;  %v356_v28 = vmul.f32 %v582_v59, %v347_v18 }
  0xad   : > { %v396_v40 = vadd.f32 %v392_v31, %v363_v35 }
  0xae   : > { %v360_v29 = vmul.f32 %v358_v13, %v355_v24  ;;  %v361_v37 = vmul.f32 %v358_v13, %v356_v28 }
  0xb0   : > { %v364_v33 = vadd.f32 %v360_v29, %v331_v25  ;;  %v365_v51 = vadd.f32 %v361_v37, %v332_v43 }
  0xb2   : > { %v397_v38 = vadd.f32 %v393_v32, %v364_v33  ;;  %v398_v57 = vadd.f32 %v394_v54, %v365_v51 }
  0xb3   : > { %v418_v41 = vpop.permute.xlu1 %417  ;;  %v403_v42 = vpop.permute.xlu0 %402 }
  0xb4   : > { %v421_v44 = vmul.f32 %v408_v36, %v397_v38  ;;  %v423_v45 = vmul.f32 %v418_v41, %v399_v39  ;;  %v420_v46 = vmul.f32 %v403_v42, %v396_v40 }
  0xb6   : > { %v425_v48 = vrot.slane %v421_v44, 7  ;;  %v427_v49 = vrot.slane %v423_v45, 7  ;;  %v424_v50 = vrot.slane %v420_v46, 7 }
  0xb8   : > { %v430_v52 = vsel %vm252_vm1, %v424_v50, %v425_v48  ;;  %v431_v53 = vsel %vm252_vm1, %v427_v49, %v424_v50 }
  0xb9   : > { %v432_v55 = vmul.f32 %v825_v7, %v431_v53  ;;  %v437_v56 = vmul.f32 %v430_v52, %v391_v26 }
  0xbb   : > { %v436_v58 = vmul.f32 %v432_v55, %v391_v26  ;;  %v413_v59 = vpop.permute.xlu0 %412  ;;  %v441_v62 = vadd.f32 %v437_v56, %v397_v38 }
  0xbc   : > { %v422_v60 = vmul.f32 %v413_v59, %v398_v57 }
  0xbd   : > { %v440_v61 = vadd.f32 %v436_v58, %v396_v40 }
  0xbe   : > { %v426_v63 = vrot.slane %v422_v60, 7 }
  0xbf   : > { %v587_v0 = vpack.c.bf16 %v441_v62, %v440_v61 }
  0xc0   : > { %v428_v7 = vsel %vm252_vm1, %v426_v63, %v427_v49  ;;  %v429_v1 = vsel %vm252_vm1, %v425_v48, %v426_v63 }
  0xc1   : > { %588 = vst [vmem:[%s192_s29] sm:$0xff] %v587_v0   ;;  %v438_v3 = vmul.f32 %v429_v1, %v391_v26  ;;  %v439_v4 = vmul.f32 %v428_v7, %v391_v26 }
  0xc3   : > { %v442_v5 = vadd.f32 %v438_v3, %v398_v57  ;;  %v443_v6 = vadd.f32 %v439_v4, %v399_v39 }
  0xc5   : > { %v592_v8 = vpack.c.bf16 %v443_v6, %v442_v5 }
  0xc7   : > { %595 = vst [vmem:[%s192_s29 + $0x8] sm:$0xff] %v592_v8  }
  0xc8   : > { %695 = shalt.err (!%p692_p8)
}
  0xc9   : > { %s739_s17 = smov 64   ;;  %s740_s19 = smov 4  }
  0xca   : > { %600 = dma.vmem_to_hbm [thread:$0]  (%p799_p5), %s466_s16, 256, %s468_s30, %s453_s4, %s739_s17, %s739_s17, %s740_s19  }
  0xcb PF: > { %p612_p9 = scmp.ge.s32.totalorder %s734_s15, 2  ;;  %s482_s20 = sand.u32 1, %s722_s12  }
  0xcc   : > { %s483_s24 = scalar_lea.sflag [#allocation3], %s482_s20 }
  0xcd   : > { %p607_p10 = pnand %p612_p9, %p803_p6 }
  0xcf   : > { %p608_p11 = pneg %p607_p10 }
  0xd1   : > { %717 = dma.done.wait (%p608_p11), %s483_s24, 256  }
  0xd2   : > { %719 = vsyncadd (%p608_p11), %s483_s24, 4294967040  ;;  %p14_p12 = scmp.ge.s32.totalorder %s786_s18, 4   ;;  %s922_s12 = smov %s726_s13 }
  0xd3   : > { %s923_s13 = smov %s730_s14  ;;  %s924_s14 = smov %s797_s21 }
  0xd4   : > { %s925_s15 = smov %s786_s18  ;;  %16 = sbr.rel (!%p14_p12) target bundleno = 4 (0x4), region = 75 }
  0xd9   :  { %489 = vsyncpa [#allocation3], 1 }
  0xda   :  { %491 = vsyncpa [#allocation3 + $0x1], 1 }
  0xdb   :  { %492 = vsyncpa [#allocation4], 1 }
  0xdc   :  { %494 = vsyncpa [#allocation4 + $0x1], 1 }

</bundles_post_ra>
